<compile_context>
chip_gen: v7x
topology: tpu7x:2x2x1
jax: 0.10.0
libtpu: 0.0.40
codegen_flags: <defaults>
</compile_context>

<pallas_src>
import functools

import jax
import jax.numpy as jnp
from jax.experimental import pallas as pl
from jax.experimental.pallas import tpu as pltpu

FORCE_POSITIVE = "softplus"   # {"softplus", "sigmoid", other}
DISTANCE = "euclidean"        # {"euclidean", "cosine", other -> dot product}
PAIRWISE_EPS = 1e-6           # torch.nn.PairwiseDistance default eps
COSINE_EPS = 1e-8             # torch.nn.CosineSimilarity default eps


def _round_up(x, m):
    return (x + m - 1) // m * m


def rater_triplet_kernel(x_item_ref, x_rater_ref, x_last_ref,
                         w_item_bd_ref, w_rs_ref, out_ref, *, num_dims):
    D = num_dims

    # Two fused MXU passes (f32 accumulate).
    item_embed = jnp.dot(x_item_ref[...], w_item_bd_ref[...],
                         preferred_element_type=jnp.float32)      # (tb, 3D)
    rs = jnp.dot(x_rater_ref[...], w_rs_ref[...],
                 preferred_element_type=jnp.float32)              # (tb, rs_cols)

    # Lane-dense layout: batch on lanes, feature dim (D=8) on sublanes.
    item_t = item_embed.T                                         # (3D, tb)
    rs_t = rs.T                                                   # (rs_cols, tb)
    rater_t = rs_t[0:D, :]                                        # (D, tb)
    seq_t = rs_t[D:D + 1, :]                                      # (1, tb)

    # force_positive nonlinearity (matches x_rater_embed[:, None, :] bcast).
    if FORCE_POSITIVE == "sigmoid":
        gate = jax.nn.softplus(rater_t)
        act = jax.nn.sigmoid(item_t)
    elif FORCE_POSITIVE == "softplus":
        gate = jax.nn.sigmoid(rater_t)
        act = jax.nn.softplus(item_t)
    else:
        gate = None
        act = item_t

    e0 = act[0 * D:1 * D, :]
    e1 = act[1 * D:2 * D, :]
    e2 = act[2 * D:3 * D, :]
    if gate is not None:
        e0 = e0 * gate
        e1 = e1 * gate
        e2 = e2 * gate

    # embed_left  = x_item_embed[:, [1, 0, 0], :]
    # embed_right = x_item_embed[:, [2, 2, 1], :]
    pairs = ((e1, e2), (e0, e2), (e0, e1))

    rows = []
    for left, right in pairs:
        if DISTANCE == "euclidean":
            # torch.nn.PairwiseDistance adds eps to every diff component.
            diff = left - right + PAIRWISE_EPS
            dist = jnp.sqrt(jnp.sum(diff * diff, axis=0, keepdims=True))
            rows.append(1.0 - dist)                               # (1, tb)
        elif DISTANCE == "cosine":
            dotp = jnp.sum(left * right, axis=0, keepdims=True)
            nl = jnp.maximum(jnp.sqrt(jnp.sum(left * left, axis=0,
                                              keepdims=True)), COSINE_EPS)
            nr = jnp.maximum(jnp.sqrt(jnp.sum(right * right, axis=0,
                                              keepdims=True)), COSINE_EPS)
            rows.append(dotp / (nl * nr))
        else:
            rows.append(jnp.sum(left * right, axis=0, keepdims=True))

    proximity = jnp.concatenate(rows, axis=0)                     # (3, tb)
    out_ref[...] = jnp.exp(proximity + x_last_ref[...] * seq_t)   # (3, tb)


def rater_model_triplet_forward(x_item, x_rater, x_last_selected,
                                w_item, w_rater, w_seq, *, tile_b=1024):
    """Pallas forward.

    x_item (bsz, 3, dim_items); x_rater (bsz, dim_raters);
    x_last_selected (bsz, 3); weights in torch Linear layout (out, in).
    Returns (bsz, 3).
    """
    bsz, three, dim_items = x_item.shape
    assert three == 3
    num_dims = w_item.shape[0]
    dim_raters = w_rater.shape[1]

    x_item = jnp.asarray(x_item, jnp.float32)
    x_rater = jnp.asarray(x_rater, jnp.float32)
    x_last_selected = jnp.asarray(x_last_selected, jnp.float32)

    # Tile selection: multi-tile blocks must be lane-aligned (mult of 128);
    # a single full-batch tile only needs sublane alignment (mult of 8).
    if bsz >= tile_b:
        tb = _round_up(tile_b, 128)
    else:
        tb = _round_up(bsz, 8)
    padded = _round_up(bsz, tb)
    num_tiles = padded // tb

    # Flatten triplet axis (free, contiguous) and transpose the tiny x_last.
    x_item_flat = x_item.reshape(bsz, 3 * dim_items)
    x_last_t = x_last_selected.T                                  # (3, bsz)
    if padded != bsz:
        pad = padded - bsz
        x_item_flat = jnp.pad(x_item_flat, ((0, pad), (0, 0)))
        x_rater = jnp.pad(x_rater, ((0, pad), (0, 0)))
        x_last_t = jnp.pad(x_last_t, ((0, 0), (0, pad)))

    # Fused weights (tiny, built once per call, VMEM-resident in the kernel).
    w_item_t = jnp.asarray(w_item, jnp.float32).T                 # (dI, D)
    w_item_bd = jnp.zeros((3 * dim_items, 3 * num_dims), jnp.float32)
    for k in range(3):
        w_item_bd = w_item_bd.at[k * dim_items:(k + 1) * dim_items,
                                 k * num_dims:(k + 1) * num_dims].set(w_item_t)

    rs_cols = _round_up(num_dims + 1, 8)
    w_rs = jnp.zeros((dim_raters, rs_cols), jnp.float32)
    w_rs = w_rs.at[:, :num_dims].set(jnp.asarray(w_rater, jnp.float32).T)
    w_rs = w_rs.at[:, num_dims].set(jnp.asarray(w_seq, jnp.float32).reshape(-1))

    kernel = functools.partial(rater_triplet_kernel, num_dims=num_dims)

    # Advisory cost estimate (memory-bound workload).
    flops = padded * (2 * (3 * dim_items * 3 * num_dims + dim_raters * rs_cols)
                      + 40 * num_dims)
    transcendentals = padded * (4 * num_dims + 6)
    bytes_accessed = (padded * 4 * (3 * dim_items + dim_raters + 3 + 3)
                      + 4 * (w_item_bd.size + w_rs.size))

    out_t = pl.pallas_call(
        kernel,
        out_shape=jax.ShapeDtypeStruct((3, padded), jnp.float32),
        grid=(num_tiles,),
        in_specs=[
            pl.BlockSpec((tb, 3 * dim_items), lambda i: (i, 0)),   # x_item
            pl.BlockSpec((tb, dim_raters), lambda i: (i, 0)),      # x_rater
            pl.BlockSpec((3, tb), lambda i: (0, i)),               # x_last^T
            pl.BlockSpec((3 * dim_items, 3 * num_dims),
                         lambda i: (0, 0)),                        # blockdiag W_item^T
            pl.BlockSpec((dim_raters, rs_cols), lambda i: (0, 0)), # [W_rater^T|W_seq^T]
        ],
        out_specs=pl.BlockSpec((3, tb), lambda i: (0, i)),
        compiler_params=pltpu.CompilerParams(
            dimension_semantics=("parallel",),
            vmem_limit_bytes=32 * 1024 * 1024),
        cost_estimate=pl.CostEstimate(
            flops=flops, transcendentals=transcendentals,
            bytes_accessed=bytes_accessed),
    )(x_item_flat, x_rater, x_last_t, w_item_bd, w_rs)

    return out_t[:, :bsz].T                                       # (bsz, 3)


def rater_model_triplet_reference(x_item, x_rater, x_last_selected,
                                  w_item, w_rater, w_seq):
    """Plain-JAX reference mirroring the PyTorch forward."""
    x_item_embed = jnp.einsum("bkd,nd->bkn", x_item, w_item)
    x_rater_embed = x_rater @ w_rater.T
    x_sequence_embed = x_rater @ w_seq.T
    if FORCE_POSITIVE == "sigmoid":
        x_item_embed = (jax.nn.sigmoid(x_item_embed)
                        * jax.nn.softplus(x_rater_embed)[:, None, :])
    elif FORCE_POSITIVE == "softplus":
        x_item_embed = (jax.nn.softplus(x_item_embed)
                        * jax.nn.sigmoid(x_rater_embed)[:, None, :])
    bsz = x_item.shape[0]
    left = x_item_embed[:, jnp.array([1, 0, 0]), :].reshape(bsz * 3, -1)
    right = x_item_embed[:, jnp.array([2, 2, 1]), :].reshape(bsz * 3, -1)
    if DISTANCE == "euclidean":
        d = jnp.sqrt(jnp.sum((left - right + PAIRWISE_EPS) ** 2, axis=1))
        prox = (1.0 - d).reshape(bsz, -1)
    elif DISTANCE == "cosine":
        dotp = jnp.sum(left * right, axis=1)
        nl = jnp.maximum(jnp.linalg.norm(left, axis=1), COSINE_EPS)
        nr = jnp.maximum(jnp.linalg.norm(right, axis=1), COSINE_EPS)
        prox = (dotp / (nl * nr)).reshape(bsz, -1)
    else:
        prox = jnp.sum(left * right, axis=1).reshape(bsz, -1)
    return jnp.exp(prox + x_last_selected * x_sequence_embed)


if __name__ == "__main__":
    def run_case(bsz, dim_items, dim_raters, num_dims, tile_b, seed):
        key = jax.random.PRNGKey(seed)
        k1, k2, k3, k4, k5, k6 = jax.random.split(key, 6)
        x_item = jax.random.normal(k1, (bsz, 3, dim_items), dtype=jnp.float32)
        x_rater = jax.random.normal(k2, (bsz, dim_raters), dtype=jnp.float32)
        x_last = jax.random.bernoulli(k3, 0.5, (bsz, 3)).astype(jnp.float32)
        # torch Linear weight layout: (out, in)
        w_item = 0.1 * jax.random.normal(k4, (num_dims, dim_items), dtype=jnp.float32)
        w_rater = 0.1 * jax.random.normal(k5, (num_dims, dim_raters), dtype=jnp.float32)
        w_seq = 0.1 * jax.random.normal(k6, (1, dim_raters), dtype=jnp.float32)

        out = rater_model_triplet_forward(x_item, x_rater, x_last,
                                          w_item, w_rater, w_seq, tile_b=tile_b)
        out = jax.block_until_ready(out)
        ref = rater_model_triplet_reference(x_item, x_rater, x_last,
                                            w_item, w_rater, w_seq)
        assert out.shape == (bsz, 3)
        assert jnp.allclose(out, ref, rtol=1e-5, atol=1e-5), (out, ref)

    # Small single-tile case (whole batch in one block).
    run_case(bsz=8, dim_items=32, dim_raters=16, num_dims=8, tile_b=1024, seed=0)
    # Multi-tile case with a remainder (exercises grid pipelining + padding).
    run_case(bsz=300, dim_items=32, dim_raters=16, num_dims=8, tile_b=128, seed=1)

    # TODO(synk): loss/update/test (training loop, Adam, LR scheduling,
    # regularization) are host-side training utilities, not forward hot path.
    print("KERNEL_OK")
</pallas_src>

<mosaic_0001>
module attributes {stable_mosaic.version = 11 : i64} {
  func.func @rater_triplet_kernel(%arg0: i32, %arg1: memref<8x96xf32, #tpu.memory_space<vmem>>, %arg2: memref<8x16xf32, #tpu.memory_space<vmem>>, %arg3: memref<3x8xf32, #tpu.memory_space<vmem>>, %arg4: memref<96x24xf32, #tpu.memory_space<vmem>>, %arg5: memref<16x16xf32, #tpu.memory_space<vmem>>, %arg6: memref<3x8xf32, #tpu.memory_space<vmem>>) attributes {dimension_semantics = [#tpu.dimension_semantics<parallel>], iteration_bounds = array<i64: 1>, scalar_prefetch = 0 : i64, scratch_operands = 0 : i64, tpu.core_type = #tpu.core_type<tc>, window_params = [{transform_indices = @transform_0, window_bounds = array<i64: 8, 96>}, {transform_indices = @transform_1, window_bounds = array<i64: 8, 16>}, {transform_indices = @transform_2, window_bounds = array<i64: 3, 8>}, {pipeline_mode = #tpu.pipeline_mode<synchronous>, transform_indices = @transform_3, window_bounds = array<i64: 96, 24>}, {pipeline_mode = #tpu.pipeline_mode<synchronous>, transform_indices = @transform_4, window_bounds = array<i64: 16, 16>}, {transform_indices = @transform_5, window_bounds = array<i64: 3, 8>}]} {
    %c0 = arith.constant 0 : index
    %c0_0 = arith.constant 0 : index
    %0 = vector.load %arg1[%c0, %c0_0] : memref<8x96xf32, #tpu.memory_space<vmem>>, vector<8x96xf32>
    %c0_1 = arith.constant 0 : index
    %c0_2 = arith.constant 0 : index
    %1 = vector.load %arg4[%c0_1, %c0_2] : memref<96x24xf32, #tpu.memory_space<vmem>>, vector<96x24xf32>
    %cst = arith.constant dense<0.000000e+00> : vector<8x24xf32>
    %2 = tpu.matmul %0, %1, %cst {dimension_numbers = #tpu.dot_dimension_numbers<[1], [0], [0], [1], [0, 0, 1, 1], [], []>} : vector<8x96xf32>, vector<96x24xf32>, vector<8x24xf32> -> vector<8x24xf32>
    %c0_3 = arith.constant 0 : index
    %c0_4 = arith.constant 0 : index
    %3 = vector.load %arg2[%c0_3, %c0_4] : memref<8x16xf32, #tpu.memory_space<vmem>>, vector<8x16xf32>
    %c0_5 = arith.constant 0 : index
    %c0_6 = arith.constant 0 : index
    %4 = vector.load %arg5[%c0_5, %c0_6] : memref<16x16xf32, #tpu.memory_space<vmem>>, vector<16x16xf32>
    %cst_7 = arith.constant dense<0.000000e+00> : vector<8x16xf32>
    %5 = tpu.matmul %3, %4, %cst_7 {dimension_numbers = #tpu.dot_dimension_numbers<[1], [0], [0], [1], [0, 0, 1, 1], [], []>} : vector<8x16xf32>, vector<16x16xf32>, vector<8x16xf32> -> vector<8x16xf32>
    %6 = tpu.transpose %2, [1, 0] : vector<8x24xf32> -> vector<24x8xf32>
    %7 = tpu.transpose %5, [1, 0] : vector<8x16xf32> -> vector<16x8xf32>
    %8 = vector.extract_strided_slice %7 {offsets = [0, 0], sizes = [8, 8], strides = [1, 1]} : vector<16x8xf32> to vector<8x8xf32>
    %9 = vector.extract_strided_slice %7 {offsets = [8, 0], sizes = [1, 8], strides = [1, 1]} : vector<16x8xf32> to vector<1x8xf32>
    %10 = arith.negf %8 : vector<8x8xf32>
    %11 = math.exp %10 : vector<8x8xf32>
    %cst_8 = arith.constant 1.000000e+00 : f32
    %12 = vector.broadcast %cst_8 : f32 to vector<8x8xf32>
    %13 = arith.addf %12, %11 : vector<8x8xf32>
    %14 = arith.divf %12, %13 : vector<8x8xf32>
    %cst_9 = arith.constant 0.000000e+00 : f32
    %15 = vector.broadcast %cst_9 : f32 to vector<24x8xf32>
    %16 = arith.maximumf %6, %15 : vector<24x8xf32>
    %17 = vector.broadcast %cst_9 : f32 to vector<24x8xf32>
    %18 = arith.subf %6, %17 : vector<24x8xf32>
    %19 = arith.cmpf one, %18, %18 : vector<24x8xf32>
    %20 = vector.broadcast %cst_9 : f32 to vector<24x8xf32>
    %21 = arith.addf %6, %20 : vector<24x8xf32>
    %22 = math.absf %18 : vector<24x8xf32>
    %cst_10 = arith.constant 0.000000e+00 : f32
    %23 = vector.broadcast %cst_10 : f32 to vector<24x8xf32>
    %24 = arith.subf %23, %22 : vector<24x8xf32>
    %25 = math.exp %24 : vector<24x8xf32>
    %26 = math.log1p %25 : vector<24x8xf32>
    %27 = arith.addf %16, %26 : vector<24x8xf32>
    %28 = arith.select %19, %21, %27 : vector<24x8xi1>, vector<24x8xf32>
    %29 = vector.extract_strided_slice %28 {offsets = [0, 0], sizes = [8, 8], strides = [1, 1]} : vector<24x8xf32> to vector<8x8xf32>
    %30 = vector.extract_strided_slice %28 {offsets = [8, 0], sizes = [8, 8], strides = [1, 1]} : vector<24x8xf32> to vector<8x8xf32>
    %31 = vector.extract_strided_slice %28 {offsets = [16, 0], sizes = [8, 8], strides = [1, 1]} : vector<24x8xf32> to vector<8x8xf32>
    %32 = arith.mulf %29, %14 : vector<8x8xf32>
    %33 = arith.mulf %30, %14 : vector<8x8xf32>
    %34 = arith.mulf %31, %14 : vector<8x8xf32>
    %35 = arith.subf %33, %34 : vector<8x8xf32>
    %cst_11 = arith.constant 9.99999997E-7 : f32
    %36 = vector.broadcast %cst_11 : f32 to vector<8x8xf32>
    %37 = arith.addf %35, %36 : vector<8x8xf32>
    %38 = arith.mulf %37, %37 : vector<8x8xf32>
    %cst_12 = arith.constant dense<0.000000e+00> : vector<8xf32>
    %39 = vector.multi_reduction <add>, %38, %cst_12 [0] : vector<8x8xf32> to vector<8xf32>
    %40 = vector.shape_cast %39 : vector<8xf32> to vector<1x8xf32>
    %41 = math.sqrt %40 : vector<1x8xf32>
    %cst_13 = arith.constant 1.000000e+00 : f32
    %42 = vector.broadcast %cst_13 : f32 to vector<1x8xf32>
    %43 = arith.subf %42, %41 : vector<1x8xf32>
    %44 = arith.subf %32, %34 : vector<8x8xf32>
    %cst_14 = arith.constant 9.99999997E-7 : f32
    %45 = vector.broadcast %cst_14 : f32 to vector<8x8xf32>
    %46 = arith.addf %44, %45 : vector<8x8xf32>
    %47 = arith.mulf %46, %46 : vector<8x8xf32>
    %cst_15 = arith.constant dense<0.000000e+00> : vector<8xf32>
    %48 = vector.multi_reduction <add>, %47, %cst_15 [0] : vector<8x8xf32> to vector<8xf32>
    %49 = vector.shape_cast %48 : vector<8xf32> to vector<1x8xf32>
    %50 = math.sqrt %49 : vector<1x8xf32>
    %cst_16 = arith.constant 1.000000e+00 : f32
    %51 = vector.broadcast %cst_16 : f32 to vector<1x8xf32>
    %52 = arith.subf %51, %50 : vector<1x8xf32>
    %53 = arith.subf %32, %33 : vector<8x8xf32>
    %cst_17 = arith.constant 9.99999997E-7 : f32
    %54 = vector.broadcast %cst_17 : f32 to vector<8x8xf32>
    %55 = arith.addf %53, %54 : vector<8x8xf32>
    %56 = arith.mulf %55, %55 : vector<8x8xf32>
    %cst_18 = arith.constant dense<0.000000e+00> : vector<8xf32>
    %57 = vector.multi_reduction <add>, %56, %cst_18 [0] : vector<8x8xf32> to vector<8xf32>
    %58 = vector.shape_cast %57 : vector<8xf32> to vector<1x8xf32>
    %59 = math.sqrt %58 : vector<1x8xf32>
    %cst_19 = arith.constant 1.000000e+00 : f32
    %60 = vector.broadcast %cst_19 : f32 to vector<1x8xf32>
    %61 = arith.subf %60, %59 : vector<1x8xf32>
    %62 = tpu.concatenate %43, %52, %61 in 0 : vector<1x8xf32>, vector<1x8xf32>, vector<1x8xf32> -> vector<3x8xf32>
    %c0_20 = arith.constant 0 : index
    %c0_21 = arith.constant 0 : index
    %63 = vector.load %arg3[%c0_20, %c0_21] : memref<3x8xf32, #tpu.memory_space<vmem>>, vector<3x8xf32>
    %64 = vector.broadcast %9 : vector<1x8xf32> to vector<3x8xf32>
    %65 = arith.mulf %63, %64 : vector<3x8xf32>
    %66 = arith.addf %62, %65 : vector<3x8xf32>
    %67 = math.exp %66 : vector<3x8xf32>
    %c0_22 = arith.constant 0 : index
    %c0_23 = arith.constant 0 : index
    %68 = vector.load %arg6[%c0_22, %c0_23] : memref<3x8xf32, #tpu.memory_space<vmem>>, vector<3x8xf32>
    tpu.vector_store %arg6[%c0_22, %c0_23], %67 {strides = array<i32>} : memref<3x8xf32, #tpu.memory_space<vmem>>, vector<3x8xf32>,
    return
  }
  func.func @transform_0(%arg0: i32) -> (i32, i32) {
    %c0_i32 = arith.constant 0 : i32
    %c0_i32_0 = arith.constant 0 : i32
    return %arg0, %c0_i32 : i32, i32
  }
  func.func @transform_1(%arg0: i32) -> (i32, i32) {
    %c0_i32 = arith.constant 0 : i32
    %c0_i32_0 = arith.constant 0 : i32
    return %arg0, %c0_i32 : i32, i32
  }
  func.func @transform_2(%arg0: i32) -> (i32, i32) {
    %c0_i32 = arith.constant 0 : i32
    %c0_i32_0 = arith.constant 0 : i32
    return %c0_i32, %arg0 : i32, i32
  }
  func.func @transform_3(%arg0: i32) -> (i32, i32) {
    %c0_i32 = arith.constant 0 : i32
    %c0_i32_0 = arith.constant 0 : i32
    %c0_i32_1 = arith.constant 0 : i32
    return %c0_i32, %c0_i32_0 : i32, i32
  }
  func.func @transform_4(%arg0: i32) -> (i32, i32) {
    %c0_i32 = arith.constant 0 : i32
    %c0_i32_0 = arith.constant 0 : i32
    %c0_i32_1 = arith.constant 0 : i32
    return %c0_i32, %c0_i32_0 : i32, i32
  }
  func.func @transform_5(%arg0: i32) -> (i32, i32) {
    %c0_i32 = arith.constant 0 : i32
    %c0_i32_0 = arith.constant 0 : i32
    return %c0_i32, %arg0 : i32, i32
  }
}

</mosaic_0001>

<bundles_post_ra>
// kernel: tpu_custom_call.1
= control target key start
LH: loop header
LB: loop body
LE: loop exit
PB: predicated region body
PF: predicated region fallthrough
CT: control target
= control target key end

     0   :  { %v522_v3 = vmov 0.0|0.0   ;;  %vm523_vm0 = vmmov 0   ;;  %v524_v6 = vmov 0.0   ;;  %s619_s0 = inlined_call_operand.vmem [shape: f32[8,96], index: 0, kind: input, shape index: {}]   ;;  %s620_s1 = inlined_call_operand.vmem [shape: f32[8,16], index: 1, kind: input, shape index: {}]   ;;  %s621_s2 = inlined_call_operand.vmem [shape: f32[3,8], index: 2, kind: input, shape index: {}]   ;;  %s622_s3 = inlined_call_operand.vmem [shape: f32[96,24], index: 3, kind: input, shape index: {}]   ;;  %s623_s4 = inlined_call_operand.vmem [shape: f32[16,16], index: 4, kind: input, shape index: {}]   ;;  %s624_s5 = inlined_call_operand.hbm [shape: f32[3,8], index: 5, kind: output, shape index: {}]  }
   0x1   :  { %v22_v0 = vld [vmem:[%s622_s3] sm:$0xff]  ;;  %v23_v1 = vld [vmem:[%s622_s3 + $0x8] sm:$0xff]  ;;  %v24_v2 = vld [vmem:[%s622_s3 + $0x10] sm:$0xff]  ;;  %449 = vmatprep.subr.bf16.mxu0 %v522_v3  ;;  %439 = vmatprep.mubr.msk.f32.mxu0 %vm523_vm0, %v524_v6 }
   0x2   :  { %v450_v4 = vpack.c.bf16 %v23_v1, %v22_v0  ;;  %v25_v5 = vld [vmem:[%s622_s3 + $0x18] sm:$0xff]  ;;  %467 = vmatprep.subr.bf16.mxu1 %v522_v3  ;;  %446 = vmatprep.mubr.msk.f32.mxu1 %vm523_vm0, %v524_v6  ;;  %v26_v8 = vld [vmem:[%s622_s3 + $0x20] sm:$0xff]  ;;  %v27_v9 = vld [vmem:[%s622_s3 + $0x28] sm:$0xff] }
   0x3   :  { %v453_v7 = vpack.c.bf16 %v25_v5, %v24_v2  ;;  %v109_v10 = vld [vmem:[%s623_s4] sm:$0xff]  ;;  %v110_v11 = vld [vmem:[%s623_s4 + $0x8] sm:$0xff] }
   0x4   :  { %451 = vmatpush3.bf16.msra.mxu0 %v450_v4  ;;  %v468_v12 = vpack.c.bf16 %v110_v11, %v109_v10 }
   0x5   :  { %452 = vmatprep.subr.bf16.mxu0 %v522_v3 }
   0x6   :  { %10 = vsyncpa [#allocation3], 0  ;;  %v456_v13 = vpack.c.bf16 %v27_v9, %v26_v8  ;;  %469 = vmatpush3.bf16.msra.mxu1 %v468_v12  ;;  %v108_v14 = vld [vmem:[%s620_s1] sm:$0xff]  ;;  %vm111_vm1 = vcmask 130048   ;;  %v28_v15 = vld [vmem:[%s622_s3 + $0x30] sm:$0xff]  ;;  %vm34_vm2 = vcmask 785408  }
   0x7   :  { %v29_v16 = vld [vmem:[%s622_s3 + $0x38] sm:$0xff]  ;;  %v30_v18 = vld [vmem:[%s622_s3 + $0x40] sm:$0xff]  ;;  %v31_v19 = vld [vmem:[%s622_s3 + $0x48] sm:$0xff]  ;;  %vm315_vm9 = vcmask 64512   ;;  %vm367_vm0 = vcmask 1040384   ;;  %s525_s23 = smov [#allocation2]  }
   0x8   :  { %454 = vmatpush3.bf16.msra.mxu0 %v453_v7  ;;  %v459_v17 = vpack.c.bf16 %v29_v16, %v28_v15  ;;  %v462_v20 = vpack.c.bf16 %v31_v19, %v30_v18  ;;  %v32_v21 = vld [vmem:[%s622_s3 + $0x50] sm:$0xff]  ;;  %v33_v22 = vld [vmem:[%s622_s3 + $0x58] sm:$0xff]  ;;  %v21_v24 = vld [vmem:[%s619_s0] sm:$0xff]  ;;  %s388_s24 = sshll.u32 %s525_s23, 4  ;;  %s389_s24 = int_to_ptr.vmem [resolvable:$true] %s388_s24 }
   0x9   :  { %455 = vmatprep.subr.bf16.mxu0 %v522_v3  ;;  %447 = vmatmul.mubr.msk.f32.vlgmr.msra.gmra.mrb[0].mxu1 %vm111_vm1, %v108_v14  ;;  %v465_v23 = vpack.c.bf16 %v33_v22, %v32_v21  ;;  %vm369_vm1 = vcmask 1041408   ;;  %p503_p1 = scmp.lt.s32.totalorder %s389_s24, %s389_s24 }
   0xc   :  { %457 = vmatpush3.bf16.msra.mxu0 %v456_v13 }
   0xd   :  { %458 = vmatprep.subr.bf16.mxu0 %v522_v3 }
  0x10   :  { %460 = vmatpush3.bf16.msra.mxu0 %v459_v17 }
  0x11   :  { %461 = vmatprep.subr.bf16.mxu0 %v522_v3 }
  0x14   :  { %463 = vmatpush3.bf16.msra.mxu0 %v462_v20 }
  0x15   :  { %464 = vmatprep.subr.bf16.mxu0 %v522_v3 }
  0x18   :  { %466 = vmatpush3.bf16.msra.mxu0 %v465_v23 }
  0x1b   :  { %440 = vmatmul.mubr.msk.f32.vlgmr.msra.gmra.mrb[0].mxu0 %vm34_vm2, %v21_v24  ;;  %vm380_vm2 = vcmask 59392  }
  0xdc   :  { %v181_v25 = vpop.f32.mrb[0].mxu1 }
  0xdd   :  { %v448_v26 = vpop.f32.mrb[1].mxu1 }
  0xee   :  { %v104_v27 = vpop.f32.mrb[0].mxu0 }
  0xef   :  { %185 = vxpose.xlu0.b32.start.end [1/1] (short) (narrow) %v104_v27, 24  ;;  %v441_v28 = vpop.f32.mrb[1].mxu0 }
  0xf8   :  { %217 = vxpose.xlu0.b32.start.end [1/1] (short) (narrow) %v181_v25, 16 }
 0x16f   :  { %v201_v29 = vpop.trf.xlu0 }
 0x170   :  { %v264_v30 = vand.u32 2147483647, %v201_v29  ;;  %v255_v63 = vmax.f32 %v201_v29, 0.0  ;;  %vm258_vm5 = vcmp.ne.f32.partialorder %v201_v29, %v201_v29 }
 0x172   :  { %v267_v31 = vsub.f32 0.0, %v264_v30 }
 0x173   :  { %v202_v32 = vpop.trf.xlu0 }
 0x174   :  { %v270_v33 = vmul.f32 1.442695, %v267_v31  ;;  %v265_v34 = vand.u32 2147483647, %v202_v32  ;;  %v256_v4 = vmax.f32 %v202_v32, 0.0  ;;  %vm259_vm6 = vcmp.ne.f32.partialorder %v202_v32, %v202_v32 }
 0x176   :  { %474 = vpow2.f32 %v270_v33  ;;  %v268_v35 = vsub.f32 0.0, %v265_v34 }
 0x177   :  { %v203_v36 = vpop.trf.xlu0 }
 0x178   :  { %v272_v37 = vmul.f32 1.442695, %v268_v35  ;;  %v266_v38 = vand.u32 2147483647, %v203_v36  ;;  %v257_v14 = vmax.f32 %v203_v36, 0.0  ;;  %vm260_vm8 = vcmp.ne.f32.partialorder %v203_v36, %v203_v36 }
 0x17a   :  { %476 = vpow2.f32 %v272_v37  ;;  %v269_v39 = vsub.f32 0.0, %v266_v38 }
 0x17b   :  { %v233_v40 = vpop.trf.xlu0 }
 0x17c   :  { %v274_v41 = vmul.f32 1.442695, %v269_v39  ;;  %v398_v42 = vmul.f32 -1.442695, %v233_v40 }
 0x17e   :  { %478 = vpow2.f32 %v274_v41 }
 0x17f   :  { %480 = vpow2.f32 %v398_v42 }
 0x180   :  { %v475_v43 = vpop.eup %474 }
 0x181   :  { %v276_v44 = vadd.f32 1.0, %v475_v43  ;;  %v279_v47 = vmul.f32 -0.5, %v475_v43  ;;  %v282_v54 = vand.u32 2147483647, %v475_v43 }
 0x183   :  { %482 = vlog2.f32 %v276_v44  ;;  %v280_v51 = vadd.f32 1.0, %v279_v47  ;;  %vm283_vm3 = vcmp.lt.f32.partialorder %v282_v54, 0.0004427343 }
 0x184   :  { %v477_v45 = vpop.eup %476 }
 0x185   :  { %v285_v46 = vadd.f32 1.0, %v477_v45  ;;  %v288_v52 = vmul.f32 -0.5, %v477_v45  ;;  %v281_v57 = vmul.f32 %v475_v43, %v280_v51  ;;  %v291_v60 = vand.u32 2147483647, %v477_v45 }
 0x186   :  { %v372_v51 = vlaneseq }
 0x187   :  { %484 = vlog2.f32 %v285_v46  ;;  %v289_v58 = vadd.f32 1.0, %v288_v52  ;;  %vm292_vm4 = vcmp.lt.f32.partialorder %v291_v60, 0.0004427343 }
 0x188   :  { %v479_v48 = vpop.eup %478  ;;  %v373_v52 = vshrl.u32 %v372_v51, 7 }
 0x189   :  { %v481_v49 = vpop.eup %480  ;;  %v294_v50 = vadd.f32 1.0, %v479_v48  ;;  %v297_v59 = vmul.f32 -0.5, %v479_v48  ;;  %v290_v1 = vmul.f32 %v477_v45, %v289_v58  ;;  %v300_v5 = vand.u32 2147483647, %v479_v48 }
 0x18a   :  { %v252_v53 = vadd.f32 1.0, %v481_v49 }
 0x18b   :  { %486 = vlog2.f32 %v294_v50  ;;  %v298_v2 = vadd.f32 1.0, %v297_v59  ;;  %vm301_vm7 = vcmp.lt.f32.partialorder %v300_v5, 0.0004427343 }
 0x18c   :  { %488 = vrcp.f32 %v252_v53 }
 0x18d   :  { %v483_v55 = vpop.eup %482  ;;  %v299_v11 = vmul.f32 %v479_v48, %v298_v2 }
 0x18e   :  { %v278_v56 = vmul.f32 0.6931472, %v483_v55  ;;  %v374_v55 = vsub.s32 0, %v373_v52 }
 0x190   :  { %v284_v61 = vsel %vm283_vm3, %v281_v57, %v278_v56  ;;  %v234_v56 = vpop.trf.xlu0 }
 0x191   :  { %v485_v62 = vpop.eup %484  ;;  %v303_v3 = vadd.f32 %v284_v61, %v255_v63  ;;  %v375_v61 = vrot.slane %v234_v56, %v374_v55 }
 0x192   :  { %v287_v0 = vmul.f32 0.6931472, %v485_v62 }
 0x193   :  { %v306_v12 = vsel %vm258_vm5, %v201_v29, %v303_v3  ;;  %v371_v3 = vld [vmem:[%s621_s2] sm:$0x7]  ;;  %s498_s2 = scalar_lea.vmem %s389_s24, 64 }
 0x194   :  { %v293_v6 = vsel %vm292_vm4, %v290_v1, %v287_v0  ;;  %p499_p0 = scmp.ne.s32.totalorder %s389_s24, %s498_s2  ;;  %p504_p2 = scmp.lt.s32.totalorder %s498_s2, %s498_s2 }
 0x195   :  { %v487_v7 = vpop.eup %486  ;;  %v304_v8 = vadd.f32 %v293_v6, %v256_v4 }
 0x196   :  { %v489_v9 = vpop.eup %488  ;;  %v296_v10 = vmul.f32 0.6931472, %v487_v7  ;;  %p505_p3 = por %p504_p2, %p503_p1 }
 0x197   :  { %v307_v13 = vsel %vm259_vm6, %v202_v32, %v304_v8  ;;  %v309_v16 = vmul.f32 %v489_v9, %v306_v12 }
 0x198   :  { %v302_v15 = vsel %vm301_vm7, %v299_v11, %v296_v10  ;;  %v310_v17 = vmul.f32 %v489_v9, %v307_v13  ;;  %v376_v10 = vmul.f32 %v375_v61, %v371_v3  ;;  %p506_p4 = pnand %p505_p3, %p499_p0 }
 0x199   :  { %v305_v18 = vadd.f32 %v302_v15, %v257_v14 }
 0x19a   :  { %v349_v19 = vsub.f32 %v309_v16, %v310_v17 }
 0x19b   :  { %v308_v20 = vsel %vm260_vm8, %v203_v36, %v305_v18 }
 0x19c   :  { %v311_v21 = vmul.f32 %v489_v9, %v308_v20  ;;  %v350_v22 = vadd.f32 1e-06, %v349_v19 }
 0x19e   :  { %v312_v23 = vsub.f32 %v310_v17, %v311_v21  ;;  %v331_v24 = vsub.f32 %v309_v16, %v311_v21  ;;  %v351_v25 = vmul.f32 %v350_v22, %v350_v22 }
 0x1a0   :  { %v313_v26 = vadd.f32 1e-06, %v312_v23  ;;  %v332_v27 = vadd.f32 1e-06, %v331_v24  ;;  %v352_v28 = vsel %vm315_vm9, %v351_v25, 0.0 }
 0x1a1   :  { %v353_v29 = vrot.slane %v352_v28, 4 }
 0x1a2   :  { %v314_v30 = vmul.f32 %v313_v26, %v313_v26  ;;  %v333_v31 = vmul.f32 %v332_v27, %v332_v27 }
 0x1a3   :  { %v354_v32 = vadd.f32 %v353_v29, %v352_v28 }
 0x1a4   :  { %v316_v33 = vsel %vm315_vm9, %v314_v30, 0.0  ;;  %v334_v34 = vsel %vm315_vm9, %v333_v31, 0.0 }
 0x1a5   :  { %v317_v35 = vrot.slane %v316_v33, 4  ;;  %v335_v37 = vrot.slane %v334_v34, 4  ;;  %v355_v38 = vrot.slane %v354_v32, 2 }
 0x1a7   :  { %v318_v39 = vadd.f32 %v317_v35, %v316_v33  ;;  %v336_v36 = vadd.f32 %v335_v37, %v334_v34  ;;  %v356_v40 = vadd.f32 %v355_v38, %v354_v32 }
 0x1a9   :  { %v319_v41 = vrot.slane %v318_v39, 2  ;;  %v337_v42 = vrot.slane %v336_v36, 2  ;;  %v357_v43 = vrot.slane %v356_v40, 1 }
 0x1ab   :  { %v320_v44 = vadd.f32 %v319_v41, %v318_v39  ;;  %v338_v45 = vadd.f32 %v337_v42, %v336_v36  ;;  %v358_v46 = vadd.f32 %v357_v43, %v356_v40 }
 0x1ad   :  { %v321_v47 = vrot.slane %v320_v44, 1  ;;  %v339_v48 = vrot.slane %v338_v45, 1  ;;  %490 = vrsqrt.f32 %v358_v46  ;;  %vm361_vm10 = vcmp.eq.f32.partialorder %v358_v46, inf }
 0x1ae   :  { %vm363_vm11 = vcmp.eq.f32.partialorder %v358_v46, 0.0  ;;  %v364_v0 = vand.u32 2147483648, %v358_v46 }
 0x1af   :  { %v322_v49 = vadd.f32 %v321_v47, %v320_v44  ;;  %v340_v50 = vadd.f32 %v339_v48, %v338_v45 }
 0x1b1   :  { %492 = vrsqrt.f32 %v322_v49  ;;  %vm325_vm12 = vcmp.eq.f32.partialorder %v322_v49, inf  ;;  %v328_v62 = vand.u32 2147483648, %v322_v49  ;;  %vm327_vm13 = vcmp.eq.f32.partialorder %v322_v49, 0.0 }
 0x1b2   :  { %494 = vrsqrt.f32 %v340_v50  ;;  %vm343_vm14 = vcmp.eq.f32.partialorder %v340_v50, inf  ;;  %v346_v2 = vand.u32 2147483648, %v340_v50  ;;  %vm345_vm15 = vcmp.eq.f32.partialorder %v340_v50, 0.0 }
 0x1b7   :  { %v491_v53 = vpop.eup %490 }
 0x1b8   :  { %v360_v54 = vmul.f32 %v491_v53, %v358_v46 }
 0x1ba   :  { %v362_v60 = vsel %vm361_vm10, %v358_v46, %v360_v54 }
 0x1bb   :  { %v493_v57 = vpop.eup %492  ;;  %v365_v6 = vsel %vm363_vm11, %v364_v0, %v362_v60 }
 0x1bc   :  { %v495_v58 = vpop.eup %494  ;;  %v324_v59 = vmul.f32 %v493_v57, %v322_v49  ;;  %v366_v11 = vsub.f32 1.0, %v365_v6 }
 0x1bd   :  { %v342_v63 = vmul.f32 %v495_v58, %v340_v50 }
 0x1be   :  { %v326_v1 = vsel %vm325_vm12, %v322_v49, %v324_v59 }
 0x1bf   :  { %v329_v4 = vsel %vm327_vm13, %v328_v62, %v326_v1  ;;  %v344_v5 = vsel %vm343_vm14, %v340_v50, %v342_v63 }
 0x1c0   :  { %v330_v7 = vsub.f32 1.0, %v329_v4  ;;  %v347_v8 = vsel %vm345_vm15, %v346_v2, %v344_v5 }
 0x1c1   :  { %v348_v9 = vsub.f32 1.0, %v347_v8 }
 0x1c3   :  { %v368_v12 = vsel %vm367_vm0, %v330_v7, %v348_v9 }
 0x1c4   :  { %v370_v13 = vsel %vm369_vm1, %v368_v12, %v366_v11 }
 0x1c5   :  { %v377_v14 = vadd.f32 %v376_v10, %v370_v13 }
 0x1c7   :  { %v378_v15 = vmul.f32 1.442695, %v377_v14 }
 0x1c9   :  { %496 = vpow2.f32 %v378_v15 }
 0x1d3   :  { %v497_v16 = vpop.eup %496 }
 0x1d4   :  { %381 = vst.msk [vmem:[#allocation2] sm:$0x7] %vm380_vm2, %v497_v16 }
 0x1d5   :  { %509 = shalt.err (!%p506_p4)
}
 0x1d6   :  { %s510_s27 = scalar_lea.hbm %s624_s5, 64 }
 0x1d7   :  { %p511_p5 = scmp.ne.s32.totalorder %s624_s5, %s510_s27  ;;  %p514_p6 = scmp.lt.u32.totalorder %s510_s27, %s624_s5 }
 0x1d9   :  { %p516_p7 = pnand %p514_p6, %p511_p5 }
 0x1db   :  { %519 = shalt.err (!%p516_p7)
}
 0x1dc   :  { %391 = dma.vmem_to_hbm [thread:$0]  %s389_s24, 64, %s624_s5, [#allocation3]  }
 0x1dd   :  { %520 = dma.done.wait [#allocation3], 64  }
 0x1de   :  { %521 = vsyncadd [#allocation3], 4294967232 }
 0x1df   :  { %395 = vsyncpa [#allocation3], 1 }

</bundles_post_ra>
